<compile_context>
chip_gen: v5e
topology: v5e:2x2
jax: 0.10.0
libtpu: 0.0.40
codegen_flags: <defaults>
</compile_context>

<pallas_src>
import functools

import jax
import jax.numpy as jnp
from jax.experimental import pallas as pl
from jax.experimental.pallas import tpu as pltpu


def _ceil_to(n, m):
    return ((n + m - 1) // m) * m


# ------------------------------ fused kernel --------------------------------

def _fused_kernel(*refs, fw, C, O):
    """Whole forward pass for one batch element, resident in VMEM."""
    L = len(fw)
    n_in = 3 + 9 * (L - 1) + 4
    in_refs, out_refs = refs[:n_in], refs[n_in:]
    it = iter(in_refs)
    x_ref = next(it)
    w_exp, s_exp = next(it), next(it)
    layer_refs = [tuple(next(it) for _ in range(9)) for _ in range(L - 1)]
    w_sa, b_sa, w_sh, b_sh = next(it), next(it), next(it), next(it)
    o_out, o_angs = out_refs[0], out_refs[1:]

    f32, bf16 = jnp.float32, jnp.bfloat16
    T = x_ref.shape[1]

    def relu(v):
        return jnp.maximum(v, 0.0)

    def head(act, w_r, b_r, o_r):          # 1x1 conv head (bias), dense store
        y = jnp.dot(act.astype(bf16), w_r[...],
                    preferred_element_type=f32) + b_r[...]
        o_r[0] = y.astype(o_r.dtype)

    def im2col_bf16(xf32, kw, dil, t_out):  # (T,Cin) f32 -> (t_out, kw*Cin) bf16
        if kw == 1:
            return xf32[:t_out, :].astype(bf16)
        cols = jnp.concatenate(
            [xf32[k * dil:k * dil + t_out, :] for k in range(kw)], axis=-1)
        return cols.astype(bf16)

    # ---- expand convs (main + angle fused into one matmul) ----
    x = x_ref[0]                                        # (T, 128) f32
    t_cur = T - (fw[0] - 1)
    y = jnp.dot(im2col_bf16(x, fw[0], 1, t_cur), w_exp[...],
                preferred_element_type=f32) + s_exp[...]
    y = relu(y)
    x_main = y[:, :C]                                   # (t, C)  f32
    x_ang = y[:, C:C + O]                               # (t, O)  f32

    head(x_ang, w_sa, b_sa, o_angs[0])                  # angles[0]

    dil = fw[0]
    for i in range(1, L):
        (w_c0, s_c0, w_c1m, w_c1a, s_c1,
         w_a0, s_a0, w_a1, s_a1) = layer_refs[i - 1]
        kw = fw[i]
        pad = (kw - 1) * dil // 2
        t_out = t_cur - (kw - 1) * dil

        # ---- angle path ----
        res_a = x_ang[pad:pad + t_out, :]               # residual (in-kernel slice)
        wa0 = w_a0[...]                                 # (kw, O, O) bf16
        acc = jnp.zeros((t_out, O), f32)
        for k in range(kw):                             # static taps, 64-ch path
            acc = acc + jnp.dot(
                x_ang[k * dil:k * dil + t_out, :].astype(bf16), wa0[k],
                preferred_element_type=f32)
        xa = relu(acc + s_a0[...])
        xa2 = relu(jnp.dot(xa.astype(bf16), w_a1[...],
                           preferred_element_type=f32) + s_a1[...])
        x_ang = res_a + xa2
        head(x_ang, w_sa, b_sa, o_angs[i])              # angles[i]

        # ---- main path ----
        res_m = x_main[pad:pad + t_out, :]
        xm_c = im2col_bf16(x_main, kw, dil, t_out)      # (t_out, kw*C)
        xm = relu(jnp.dot(xm_c, w_c0[...],
                          preferred_element_type=f32) + s_c0[...])
        # 1x1 conv over cat(xm, x_angle) == two accumulated matmuls
        xm2 = relu(jnp.dot(xm.astype(bf16), w_c1m[...],
                           preferred_element_type=f32)
                   + jnp.dot(x_ang.astype(bf16), w_c1a[...],
                             preferred_element_type=f32)
                   + s_c1[...])
        x_main = res_m + xm2

        t_cur = t_out
        dil *= kw

    head(x_main, w_sh, b_sh, o_out)                     # final shrink


# ------------------------ parameters & model glue ---------------------------

def _bn_fold(bn, eps=1e-5):
    scale = bn["gamma"] / jnp.sqrt(bn["var"] + eps)
    shift = bn["beta"] - bn["mean"] * scale
    return scale, shift


def init_params(key, filter_widths, channels):
    in_channels = 17 * 5 + 21 * 2          # = 127
    other = channels // 2

    def conv_w(k, kw, cin, cout):           # (K, Cin, Cout) layout
        return jax.random.normal(k, (kw, cin, cout), jnp.float32) / jnp.sqrt(
            float(cin * kw))

    def bn(c):
        # PyTorch BatchNorm1d defaults: gamma=1, beta=0, running mean/var=0/1.
        return dict(gamma=jnp.ones((c,), jnp.float32),
                    beta=jnp.zeros((c,), jnp.float32),
                    mean=jnp.zeros((c,), jnp.float32),
                    var=jnp.ones((c,), jnp.float32))

    keys = iter(jax.random.split(key, 64))
    fw0 = filter_widths[0]
    p = {
        "expand_conv": conv_w(next(keys), fw0, in_channels, channels),
        "expand_bn": bn(channels),
        "expand_conv_angle": conv_w(next(keys), fw0, in_channels, other),
        "expand_bn_angle": bn(other),
        "layers_conv": [], "layers_bn": [],
        "layers_conv_angle": [], "layers_bn_angle": [],
    }
    for i in range(1, len(filter_widths)):
        fwi = filter_widths[i]
        p["layers_conv"].append(conv_w(next(keys), fwi, channels, channels))
        p["layers_bn"].append(bn(channels))
        p["layers_conv"].append(conv_w(next(keys), 1, channels + other, channels))
        p["layers_bn"].append(bn(channels))
        p["layers_conv_angle"].append(conv_w(next(keys), fwi, other, other))
        p["layers_bn_angle"].append(bn(other))
        p["layers_conv_angle"].append(conv_w(next(keys), 1, other, other))
        p["layers_bn_angle"].append(bn(other))
    p["shrink_angle_w"] = conv_w(next(keys), 1, other, 16 * 3)
    p["shrink_angle_b"] = 0.1 * jax.random.normal(next(keys), (16 * 3,), jnp.float32)
    p["shrink_w"] = conv_w(next(keys), 1, channels, 17 * 3)
    p["shrink_b"] = 0.1 * jax.random.normal(next(keys), (17 * 3,), jnp.float32)
    return p


def prepare_fused_params(params, filter_widths, channels):
    """One-time host prep: fold BN, merge/pad/flatten weights for the kernel."""
    C, O = channels, channels // 2
    L = len(filter_widths)
    bf16, f32 = jnp.bfloat16, jnp.float32

    def fold(w, bn):
        scale, shift = _bn_fold(bn)
        return w * scale[None, None, :], shift

    in_ch = params["expand_conv"].shape[1]
    cin_pad = _ceil_to(in_ch, 128)

    # expand convs: merge main + angle along Cout, pad Cin 127->128, flatten taps
    w_e, sh_e = fold(params["expand_conv"], params["expand_bn"])
    w_ea, sh_ea = fold(params["expand_conv_angle"], params["expand_bn_angle"])
    w_exp = jnp.concatenate([w_e, w_ea], axis=-1)            # (fw0, in_ch, C+O)
    w_exp = jnp.pad(w_exp, ((0, 0), (0, cin_pad - in_ch), (0, 0)))
    w_exp = w_exp.reshape(filter_widths[0] * cin_pad, C + O).astype(bf16)
    s_exp = jnp.concatenate([sh_e, sh_ea])[None, :].astype(f32)

    weights = [w_exp, s_exp]
    for i in range(1, L):
        fwi = filter_widths[i]
        w0, s0 = fold(params["layers_conv"][2 * (i - 1)],
                      params["layers_bn"][2 * (i - 1)])
        w1, s1 = fold(params["layers_conv"][2 * (i - 1) + 1],
                      params["layers_bn"][2 * (i - 1) + 1])
        wa0, sa0 = fold(params["layers_conv_angle"][2 * (i - 1)],
                        params["layers_bn_angle"][2 * (i - 1)])
        wa1, sa1 = fold(params["layers_conv_angle"][2 * (i - 1) + 1],
                        params["layers_bn_angle"][2 * (i - 1) + 1])
        w1 = w1.reshape(C + O, C)                            # 1x1 conv
        weights += [
            w0.reshape(fwi * C, C).astype(bf16), s0[None, :].astype(f32),
            w1[:C].astype(bf16), w1[C:].astype(bf16), s1[None, :].astype(f32),
            wa0.astype(bf16), sa0[None, :].astype(f32),
            wa1.reshape(O, O).astype(bf16), sa1[None, :].astype(f32),
        ]

    head_pad = _ceil_to(17 * 3, 64)
    head_pad_a = _ceil_to(16 * 3, 64)
    w_sa = jnp.pad(params["shrink_angle_w"].reshape(O, 16 * 3),
                   ((0, 0), (0, head_pad_a - 16 * 3))).astype(bf16)
    b_sa = jnp.pad(params["shrink_angle_b"],
                   (0, head_pad_a - 16 * 3))[None, :].astype(f32)
    w_sh = jnp.pad(params["shrink_w"].reshape(C, 17 * 3),
                   ((0, 0), (0, head_pad - 17 * 3))).astype(bf16)
    b_sh = jnp.pad(params["shrink_b"],
                   (0, head_pad - 17 * 3))[None, :].astype(f32)
    weights += [w_sa, b_sa, w_sh, b_sh]
    return tuple(weights)


@functools.partial(jax.jit, static_argnames=("filter_widths", "channels"))
def my_video_test_model(weights, pos_3d, pos_2d, bone_angle, *,
                        filter_widths, channels):
    """Returns (out, angles) matching MyVideoTestModel.forward (eval mode)."""
    fw = tuple(filter_widths)
    C, O = channels, channels // 2
    B, T = pos_3d.shape[:2]

    x_in = jnp.concatenate([pos_3d.reshape(B, T, -1),
                            pos_2d.reshape(B, T, -1),
                            bone_angle.reshape(B, T, -1)], axis=-1)
    in_ch = x_in.shape[-1]
    cin_pad = _ceil_to(in_ch, 128)
    if cin_pad > in_ch:
        x_in = jnp.pad(x_in, ((0, 0), (0, 0), (0, cin_pad - in_ch)))

    head_pad = _ceil_to(17 * 3, 64)
    head_pad_a = _ceil_to(16 * 3, 64)

    # output temporal lengths (receptive-field bookkeeping)
    t_list = []
    t_cur = T - (fw[0] - 1)
    t_list.append(t_cur)
    dil = fw[0]
    for kw in fw[1:]:
        t_cur -= (kw - 1) * dil
        t_list.append(t_cur)
        dil *= kw
    t_final = t_cur

    args = [x_in] + list(weights)
    in_specs = [pl.BlockSpec((1, T, cin_pad), lambda b: (b, 0, 0))]
    for w in weights:
        nd = w.ndim
        # Same block index every grid step -> weights stay resident in VMEM.
        in_specs.append(pl.BlockSpec(w.shape, lambda b, nd=nd: (0,) * nd))

    out_shape = [jax.ShapeDtypeStruct((B, t_final, head_pad), jnp.float32)]
    out_specs = [pl.BlockSpec((1, t_final, head_pad), lambda b: (b, 0, 0))]
    for t_i in t_list:
        out_shape.append(jax.ShapeDtypeStruct((B, t_i, head_pad_a), jnp.float32))
        out_specs.append(pl.BlockSpec((1, t_i, head_pad_a),
                                      lambda b: (b, 0, 0)))

    kernel = functools.partial(_fused_kernel, fw=fw, C=C, O=O)
    outs = pl.pallas_call(
        kernel,
        out_shape=tuple(out_shape),
        grid=(B,),
        in_specs=in_specs,
        out_specs=tuple(out_specs),
        compiler_params=pltpu.CompilerParams(
            dimension_semantics=("parallel",)),
    )(*args)

    out = outs[0][:, :, :17 * 3].reshape(B, t_final, 17, 3)
    angles = [a[:, :, :16 * 3].reshape(B, a.shape[1], 16, 3)
              for a in outs[1:]]
    return out, angles


# --------------------------------- main -------------------------------------

if __name__ == "__main__":
    filter_widths = [3, 3]
    channels = 128                       # other_channel = 64
    B, T = 2, 16

    key = jax.random.PRNGKey(0)
    kp, k1, k2, k3 = jax.random.split(key, 4)
    params = init_params(kp, filter_widths, channels)
    weights = prepare_fused_params(params, filter_widths, channels)

    pos_3d = jax.random.normal(k1, (B, T, 17, 3), jnp.float32)
    pos_2d = jax.random.normal(k2, (B, T, 17, 2), jnp.float32)
    bone_angle = jax.random.normal(k3, (B, T, 21, 2), jnp.float32)

    out, angles = my_video_test_model(weights, pos_3d, pos_2d, bone_angle,
                                      filter_widths=tuple(filter_widths),
                                      channels=channels)
    jax.block_until_ready(out)
    jax.block_until_ready(angles)

    # T=16 -> expand (k=3): 14 -> dilated block (k=3, d=3): 8.
    assert out.shape == (B, 8, 17, 3), out.shape
    assert angles[0].shape == (B, 14, 16, 3), angles[0].shape
    assert angles[1].shape == (B, 8, 16, 3), angles[1].shape
    print("KERNEL_OK")
</pallas_src>

<mosaic_0001>
module attributes {stable_mosaic.version = 11 : i64} {
  func.func @_fused_kernel(%arg0: i32, %arg1: memref<1x16x128xf32, #tpu.memory_space<vmem>>, %arg2: memref<384x192xbf16, #tpu.memory_space<vmem>>, %arg3: memref<1x192xf32, #tpu.memory_space<vmem>>, %arg4: memref<384x128xbf16, #tpu.memory_space<vmem>>, %arg5: memref<1x128xf32, #tpu.memory_space<vmem>>, %arg6: memref<128x128xbf16, #tpu.memory_space<vmem>>, %arg7: memref<64x128xbf16, #tpu.memory_space<vmem>>, %arg8: memref<1x128xf32, #tpu.memory_space<vmem>>, %arg9: memref<3x64x64xbf16, #tpu.memory_space<vmem>>, %arg10: memref<1x64xf32, #tpu.memory_space<vmem>>, %arg11: memref<64x64xbf16, #tpu.memory_space<vmem>>, %arg12: memref<1x64xf32, #tpu.memory_space<vmem>>, %arg13: memref<64x64xbf16, #tpu.memory_space<vmem>>, %arg14: memref<1x64xf32, #tpu.memory_space<vmem>>, %arg15: memref<128x64xbf16, #tpu.memory_space<vmem>>, %arg16: memref<1x64xf32, #tpu.memory_space<vmem>>, %arg17: memref<1x8x64xf32, #tpu.memory_space<vmem>>, %arg18: memref<1x14x64xf32, #tpu.memory_space<vmem>>, %arg19: memref<1x8x64xf32, #tpu.memory_space<vmem>>) attributes {dimension_semantics = [#tpu.dimension_semantics<parallel>], iteration_bounds = array<i64: 2>, scalar_prefetch = 0 : i64, scratch_operands = 0 : i64, tpu.core_type = #tpu.core_type<tc>, window_params = [{transform_indices = @transform_0, window_bounds = array<i64: 1, 16, 128>}, {pipeline_mode = #tpu.pipeline_mode<synchronous>, transform_indices = @transform_1, window_bounds = array<i64: 384, 192>}, {pipeline_mode = #tpu.pipeline_mode<synchronous>, transform_indices = @transform_2, window_bounds = array<i64: 1, 192>}, {pipeline_mode = #tpu.pipeline_mode<synchronous>, transform_indices = @transform_3, window_bounds = array<i64: 384, 128>}, {pipeline_mode = #tpu.pipeline_mode<synchronous>, transform_indices = @transform_4, window_bounds = array<i64: 1, 128>}, {pipeline_mode = #tpu.pipeline_mode<synchronous>, transform_indices = @transform_5, window_bounds = array<i64: 128, 128>}, {pipeline_mode = #tpu.pipeline_mode<synchronous>, transform_indices = @transform_6, window_bounds = array<i64: 64, 128>}, {pipeline_mode = #tpu.pipeline_mode<synchronous>, transform_indices = @transform_7, window_bounds = array<i64: 1, 128>}, {pipeline_mode = #tpu.pipeline_mode<synchronous>, transform_indices = @transform_8, window_bounds = array<i64: 3, 64, 64>}, {pipeline_mode = #tpu.pipeline_mode<synchronous>, transform_indices = @transform_9, window_bounds = array<i64: 1, 64>}, {pipeline_mode = #tpu.pipeline_mode<synchronous>, transform_indices = @transform_10, window_bounds = array<i64: 64, 64>}, {pipeline_mode = #tpu.pipeline_mode<synchronous>, transform_indices = @transform_11, window_bounds = array<i64: 1, 64>}, {pipeline_mode = #tpu.pipeline_mode<synchronous>, transform_indices = @transform_12, window_bounds = array<i64: 64, 64>}, {pipeline_mode = #tpu.pipeline_mode<synchronous>, transform_indices = @transform_13, window_bounds = array<i64: 1, 64>}, {pipeline_mode = #tpu.pipeline_mode<synchronous>, transform_indices = @transform_14, window_bounds = array<i64: 128, 64>}, {pipeline_mode = #tpu.pipeline_mode<synchronous>, transform_indices = @transform_15, window_bounds = array<i64: 1, 64>}, {transform_indices = @transform_16, window_bounds = array<i64: 1, 8, 64>}, {transform_indices = @transform_17, window_bounds = array<i64: 1, 14, 64>}, {transform_indices = @transform_18, window_bounds = array<i64: 1, 8, 64>}]} {
    %c0 = arith.constant 0 : index
    %c0_0 = arith.constant 0 : index
    %c0_1 = arith.constant 0 : index
    %0 = vector.load %arg1[%c0, %c0_0, %c0_1] : memref<1x16x128xf32, #tpu.memory_space<vmem>>, vector<1x16x128xf32>
    %1 = vector.shape_cast %0 : vector<1x16x128xf32> to vector<16x128xf32>
    %2 = vector.extract_strided_slice %1 {offsets = [0, 0], sizes = [14, 128], strides = [1, 1]} : vector<16x128xf32> to vector<14x128xf32>
    %3 = vector.extract_strided_slice %1 {offsets = [1, 0], sizes = [14, 128], strides = [1, 1]} : vector<16x128xf32> to vector<14x128xf32>
    %4 = vector.extract_strided_slice %1 {offsets = [2, 0], sizes = [14, 128], strides = [1, 1]} : vector<16x128xf32> to vector<14x128xf32>
    %5 = tpu.concatenate %2, %3, %4 in 1 : vector<14x128xf32>, vector<14x128xf32>, vector<14x128xf32> -> vector<14x384xf32>
    %6 = arith.truncf %5 : vector<14x384xf32> to vector<14x384xbf16>
    %c0_2 = arith.constant 0 : index
    %c0_3 = arith.constant 0 : index
    %7 = vector.load %arg2[%c0_2, %c0_3] : memref<384x192xbf16, #tpu.memory_space<vmem>>, vector<384x192xbf16>
    %cst = arith.constant dense<0.000000e+00> : vector<14x192xf32>
    %8 = tpu.matmul %6, %7, %cst {dimension_numbers = #tpu.dot_dimension_numbers<[1], [0], [0], [1], [0, 0, 1, 1], [], []>} : vector<14x384xbf16>, vector<384x192xbf16>, vector<14x192xf32> -> vector<14x192xf32>
    %c0_4 = arith.constant 0 : index
    %c0_5 = arith.constant 0 : index
    %9 = vector.load %arg3[%c0_4, %c0_5] : memref<1x192xf32, #tpu.memory_space<vmem>>, vector<1x192xf32>
    %10 = vector.broadcast %9 : vector<1x192xf32> to vector<14x192xf32>
    %11 = arith.addf %8, %10 : vector<14x192xf32>
    %cst_6 = arith.constant 0.000000e+00 : f32
    %12 = vector.broadcast %cst_6 : f32 to vector<14x192xf32>
    %13 = arith.maximumf %11, %12 : vector<14x192xf32>
    %14 = vector.extract_strided_slice %13 {offsets = [0, 0], sizes = [14, 128], strides = [1, 1]} : vector<14x192xf32> to vector<14x128xf32>
    %15 = vector.extract_strided_slice %13 {offsets = [0, 128], sizes = [14, 64], strides = [1, 1]} : vector<14x192xf32> to vector<14x64xf32>
    %16 = arith.truncf %15 : vector<14x64xf32> to vector<14x64xbf16>
    %c0_7 = arith.constant 0 : index
    %c0_8 = arith.constant 0 : index
    %17 = vector.load %arg13[%c0_7, %c0_8] : memref<64x64xbf16, #tpu.memory_space<vmem>>, vector<64x64xbf16>
    %cst_9 = arith.constant dense<0.000000e+00> : vector<14x64xf32>
    %18 = tpu.matmul %16, %17, %cst_9 {dimension_numbers = #tpu.dot_dimension_numbers<[1], [0], [0], [1], [0, 0, 1, 1], [], []>} : vector<14x64xbf16>, vector<64x64xbf16>, vector<14x64xf32> -> vector<14x64xf32>
    %c0_10 = arith.constant 0 : index
    %c0_11 = arith.constant 0 : index
    %19 = vector.load %arg14[%c0_10, %c0_11] : memref<1x64xf32, #tpu.memory_space<vmem>>, vector<1x64xf32>
    %20 = vector.broadcast %19 : vector<1x64xf32> to vector<14x64xf32>
    %21 = arith.addf %18, %20 : vector<14x64xf32>
    %c0_12 = arith.constant 0 : index
    %c0_13 = arith.constant 0 : index
    %c0_14 = arith.constant 0 : index
    %22 = vector.load %arg18[%c0_12, %c0_13, %c0_14] : memref<1x14x64xf32, #tpu.memory_space<vmem>>, vector<1x14x64xf32>
    %23 = vector.shape_cast %22 : vector<1x14x64xf32> to vector<14x64xf32>
    %24 = vector.shape_cast %21 : vector<14x64xf32> to vector<1x14x64xf32>
    tpu.vector_store %arg18[%c0_12, %c0_13, %c0_14], %24 {strides = array<i32>} : memref<1x14x64xf32, #tpu.memory_space<vmem>>, vector<1x14x64xf32>,
    %25 = vector.extract_strided_slice %15 {offsets = [3, 0], sizes = [8, 64], strides = [1, 1]} : vector<14x64xf32> to vector<8x64xf32>
    %c0_15 = arith.constant 0 : index
    %c0_16 = arith.constant 0 : index
    %c0_17 = arith.constant 0 : index
    %26 = vector.load %arg9[%c0_15, %c0_16, %c0_17] : memref<3x64x64xbf16, #tpu.memory_space<vmem>>, vector<3x64x64xbf16>
    %cst_18 = arith.constant 0.000000e+00 : f32
    %27 = vector.broadcast %cst_18 : f32 to vector<8x64xf32>
    %28 = vector.extract_strided_slice %15 {offsets = [0, 0], sizes = [8, 64], strides = [1, 1]} : vector<14x64xf32> to vector<8x64xf32>
    %29 = arith.truncf %28 : vector<8x64xf32> to vector<8x64xbf16>
    %30 = vector.extract_strided_slice %26 {offsets = [0, 0, 0], sizes = [1, 64, 64], strides = [1, 1, 1]} : vector<3x64x64xbf16> to vector<1x64x64xbf16>
    %31 = vector.shape_cast %30 : vector<1x64x64xbf16> to vector<64x64xbf16>
    %cst_19 = arith.constant dense<0.000000e+00> : vector<8x64xf32>
    %32 = tpu.matmul %29, %31, %cst_19 {dimension_numbers = #tpu.dot_dimension_numbers<[1], [0], [0], [1], [0, 0, 1, 1], [], []>} : vector<8x64xbf16>, vector<64x64xbf16>, vector<8x64xf32> -> vector<8x64xf32>
    %33 = arith.addf %27, %32 : vector<8x64xf32>
    %34 = vector.extract_strided_slice %15 {offsets = [3, 0], sizes = [8, 64], strides = [1, 1]} : vector<14x64xf32> to vector<8x64xf32>
    %35 = arith.truncf %34 : vector<8x64xf32> to vector<8x64xbf16>
    %36 = vector.extract_strided_slice %26 {offsets = [1, 0, 0], sizes = [1, 64, 64], strides = [1, 1, 1]} : vector<3x64x64xbf16> to vector<1x64x64xbf16>
    %37 = vector.shape_cast %36 : vector<1x64x64xbf16> to vector<64x64xbf16>
    %cst_20 = arith.constant dense<0.000000e+00> : vector<8x64xf32>
    %38 = tpu.matmul %35, %37, %cst_20 {dimension_numbers = #tpu.dot_dimension_numbers<[1], [0], [0], [1], [0, 0, 1, 1], [], []>} : vector<8x64xbf16>, vector<64x64xbf16>, vector<8x64xf32> -> vector<8x64xf32>
    %39 = arith.addf %33, %38 : vector<8x64xf32>
    %40 = vector.extract_strided_slice %15 {offsets = [6, 0], sizes = [8, 64], strides = [1, 1]} : vector<14x64xf32> to vector<8x64xf32>
    %41 = arith.truncf %40 : vector<8x64xf32> to vector<8x64xbf16>
    %42 = vector.extract_strided_slice %26 {offsets = [2, 0, 0], sizes = [1, 64, 64], strides = [1, 1, 1]} : vector<3x64x64xbf16> to vector<1x64x64xbf16>
    %43 = vector.shape_cast %42 : vector<1x64x64xbf16> to vector<64x64xbf16>
    %cst_21 = arith.constant dense<0.000000e+00> : vector<8x64xf32>
    %44 = tpu.matmul %41, %43, %cst_21 {dimension_numbers = #tpu.dot_dimension_numbers<[1], [0], [0], [1], [0, 0, 1, 1], [], []>} : vector<8x64xbf16>, vector<64x64xbf16>, vector<8x64xf32> -> vector<8x64xf32>
    %45 = arith.addf %39, %44 : vector<8x64xf32>
    %c0_22 = arith.constant 0 : index
    %c0_23 = arith.constant 0 : index
    %46 = vector.load %arg10[%c0_22, %c0_23] : memref<1x64xf32, #tpu.memory_space<vmem>>, vector<1x64xf32>
    %47 = vector.broadcast %46 : vector<1x64xf32> to vector<8x64xf32>
    %48 = arith.addf %45, %47 : vector<8x64xf32>
    %cst_24 = arith.constant 0.000000e+00 : f32
    %49 = vector.broadcast %cst_24 : f32 to vector<8x64xf32>
    %50 = arith.maximumf %48, %49 : vector<8x64xf32>
    %51 = arith.truncf %50 : vector<8x64xf32> to vector<8x64xbf16>
    %c0_25 = arith.constant 0 : index
    %c0_26 = arith.constant 0 : index
    %52 = vector.load %arg11[%c0_25, %c0_26] : memref<64x64xbf16, #tpu.memory_space<vmem>>, vector<64x64xbf16>
    %cst_27 = arith.constant dense<0.000000e+00> : vector<8x64xf32>
    %53 = tpu.matmul %51, %52, %cst_27 {dimension_numbers = #tpu.dot_dimension_numbers<[1], [0], [0], [1], [0, 0, 1, 1], [], []>} : vector<8x64xbf16>, vector<64x64xbf16>, vector<8x64xf32> -> vector<8x64xf32>
    %c0_28 = arith.constant 0 : index
    %c0_29 = arith.constant 0 : index
    %54 = vector.load %arg12[%c0_28, %c0_29] : memref<1x64xf32, #tpu.memory_space<vmem>>, vector<1x64xf32>
    %55 = vector.broadcast %54 : vector<1x64xf32> to vector<8x64xf32>
    %56 = arith.addf %53, %55 : vector<8x64xf32>
    %cst_30 = arith.constant 0.000000e+00 : f32
    %57 = vector.broadcast %cst_30 : f32 to vector<8x64xf32>
    %58 = arith.maximumf %56, %57 : vector<8x64xf32>
    %59 = arith.addf %25, %58 : vector<8x64xf32>
    %60 = arith.truncf %59 : vector<8x64xf32> to vector<8x64xbf16>
    %c0_31 = arith.constant 0 : index
    %c0_32 = arith.constant 0 : index
    %61 = vector.load %arg13[%c0_31, %c0_32] : memref<64x64xbf16, #tpu.memory_space<vmem>>, vector<64x64xbf16>
    %cst_33 = arith.constant dense<0.000000e+00> : vector<8x64xf32>
    %62 = tpu.matmul %60, %61, %cst_33 {dimension_numbers = #tpu.dot_dimension_numbers<[1], [0], [0], [1], [0, 0, 1, 1], [], []>} : vector<8x64xbf16>, vector<64x64xbf16>, vector<8x64xf32> -> vector<8x64xf32>
    %c0_34 = arith.constant 0 : index
    %c0_35 = arith.constant 0 : index
    %63 = vector.load %arg14[%c0_34, %c0_35] : memref<1x64xf32, #tpu.memory_space<vmem>>, vector<1x64xf32>
    %64 = vector.broadcast %63 : vector<1x64xf32> to vector<8x64xf32>
    %65 = arith.addf %62, %64 : vector<8x64xf32>
    %c0_36 = arith.constant 0 : index
    %c0_37 = arith.constant 0 : index
    %c0_38 = arith.constant 0 : index
    %66 = vector.load %arg19[%c0_36, %c0_37, %c0_38] : memref<1x8x64xf32, #tpu.memory_space<vmem>>, vector<1x8x64xf32>
    %67 = vector.shape_cast %66 : vector<1x8x64xf32> to vector<8x64xf32>
    %68 = vector.shape_cast %65 : vector<8x64xf32> to vector<1x8x64xf32>
    tpu.vector_store %arg19[%c0_36, %c0_37, %c0_38], %68 {strides = array<i32>} : memref<1x8x64xf32, #tpu.memory_space<vmem>>, vector<1x8x64xf32>,
    %69 = vector.extract_strided_slice %14 {offsets = [3, 0], sizes = [8, 128], strides = [1, 1]} : vector<14x128xf32> to vector<8x128xf32>
    %70 = vector.extract_strided_slice %14 {offsets = [0, 0], sizes = [8, 128], strides = [1, 1]} : vector<14x128xf32> to vector<8x128xf32>
    %71 = vector.extract_strided_slice %14 {offsets = [3, 0], sizes = [8, 128], strides = [1, 1]} : vector<14x128xf32> to vector<8x128xf32>
    %72 = vector.extract_strided_slice %14 {offsets = [6, 0], sizes = [8, 128], strides = [1, 1]} : vector<14x128xf32> to vector<8x128xf32>
    %73 = tpu.concatenate %70, %71, %72 in 1 : vector<8x128xf32>, vector<8x128xf32>, vector<8x128xf32> -> vector<8x384xf32>
    %74 = arith.truncf %73 : vector<8x384xf32> to vector<8x384xbf16>
    %c0_39 = arith.constant 0 : index
    %c0_40 = arith.constant 0 : index
    %75 = vector.load %arg4[%c0_39, %c0_40] : memref<384x128xbf16, #tpu.memory_space<vmem>>, vector<384x128xbf16>
    %cst_41 = arith.constant dense<0.000000e+00> : vector<8x128xf32>
    %76 = tpu.matmul %74, %75, %cst_41 {dimension_numbers = #tpu.dot_dimension_numbers<[1], [0], [0], [1], [0, 0, 1, 1], [], []>} : vector<8x384xbf16>, vector<384x128xbf16>, vector<8x128xf32> -> vector<8x128xf32>
    %c0_42 = arith.constant 0 : index
    %c0_43 = arith.constant 0 : index
    %77 = vector.load %arg5[%c0_42, %c0_43] : memref<1x128xf32, #tpu.memory_space<vmem>>, vector<1x128xf32>
    %78 = vector.broadcast %77 : vector<1x128xf32> to vector<8x128xf32>
    %79 = arith.addf %76, %78 : vector<8x128xf32>
    %cst_44 = arith.constant 0.000000e+00 : f32
    %80 = vector.broadcast %cst_44 : f32 to vector<8x128xf32>
    %81 = arith.maximumf %79, %80 : vector<8x128xf32>
    %82 = arith.truncf %81 : vector<8x128xf32> to vector<8x128xbf16>
    %c0_45 = arith.constant 0 : index
    %c0_46 = arith.constant 0 : index
    %83 = vector.load %arg6[%c0_45, %c0_46] : memref<128x128xbf16, #tpu.memory_space<vmem>>, vector<128x128xbf16>
    %cst_47 = arith.constant dense<0.000000e+00> : vector<8x128xf32>
    %84 = tpu.matmul %82, %83, %cst_47 {dimension_numbers = #tpu.dot_dimension_numbers<[1], [0], [0], [1], [0, 0, 1, 1], [], []>} : vector<8x128xbf16>, vector<128x128xbf16>, vector<8x128xf32> -> vector<8x128xf32>
    %85 = arith.truncf %59 : vector<8x64xf32> to vector<8x64xbf16>
    %c0_48 = arith.constant 0 : index
    %c0_49 = arith.constant 0 : index
    %86 = vector.load %arg7[%c0_48, %c0_49] : memref<64x128xbf16, #tpu.memory_space<vmem>>, vector<64x128xbf16>
    %cst_50 = arith.constant dense<0.000000e+00> : vector<8x128xf32>
    %87 = tpu.matmul %85, %86, %cst_50 {dimension_numbers = #tpu.dot_dimension_numbers<[1], [0], [0], [1], [0, 0, 1, 1], [], []>} : vector<8x64xbf16>, vector<64x128xbf16>, vector<8x128xf32> -> vector<8x128xf32>
    %88 = arith.addf %84, %87 : vector<8x128xf32>
    %c0_51 = arith.constant 0 : index
    %c0_52 = arith.constant 0 : index
    %89 = vector.load %arg8[%c0_51, %c0_52] : memref<1x128xf32, #tpu.memory_space<vmem>>, vector<1x128xf32>
    %90 = vector.broadcast %89 : vector<1x128xf32> to vector<8x128xf32>
    %91 = arith.addf %88, %90 : vector<8x128xf32>
    %cst_53 = arith.constant 0.000000e+00 : f32
    %92 = vector.broadcast %cst_53 : f32 to vector<8x128xf32>
    %93 = arith.maximumf %91, %92 : vector<8x128xf32>
    %94 = arith.addf %69, %93 : vector<8x128xf32>
    %95 = arith.truncf %94 : vector<8x128xf32> to vector<8x128xbf16>
    %c0_54 = arith.constant 0 : index
    %c0_55 = arith.constant 0 : index
    %96 = vector.load %arg15[%c0_54, %c0_55] : memref<128x64xbf16, #tpu.memory_space<vmem>>, vector<128x64xbf16>
    %cst_56 = arith.constant dense<0.000000e+00> : vector<8x64xf32>
    %97 = tpu.matmul %95, %96, %cst_56 {dimension_numbers = #tpu.dot_dimension_numbers<[1], [0], [0], [1], [0, 0, 1, 1], [], []>} : vector<8x128xbf16>, vector<128x64xbf16>, vector<8x64xf32> -> vector<8x64xf32>
    %c0_57 = arith.constant 0 : index
    %c0_58 = arith.constant 0 : index
    %98 = vector.load %arg16[%c0_57, %c0_58] : memref<1x64xf32, #tpu.memory_space<vmem>>, vector<1x64xf32>
    %99 = vector.broadcast %98 : vector<1x64xf32> to vector<8x64xf32>
    %100 = arith.addf %97, %99 : vector<8x64xf32>
    %c0_59 = arith.constant 0 : index
    %c0_60 = arith.constant 0 : index
    %c0_61 = arith.constant 0 : index
    %101 = vector.load %arg17[%c0_59, %c0_60, %c0_61] : memref<1x8x64xf32, #tpu.memory_space<vmem>>, vector<1x8x64xf32>
    %102 = vector.shape_cast %101 : vector<1x8x64xf32> to vector<8x64xf32>
    %103 = vector.shape_cast %100 : vector<8x64xf32> to vector<1x8x64xf32>
    tpu.vector_store %arg17[%c0_59, %c0_60, %c0_61], %103 {strides = array<i32>} : memref<1x8x64xf32, #tpu.memory_space<vmem>>, vector<1x8x64xf32>,
    return
  }
  func.func @transform_0(%arg0: i32) -> (i32, i32, i32) {
    %c0_i32 = arith.constant 0 : i32
    %c0_i32_0 = arith.constant 0 : i32
    %c0_i32_1 = arith.constant 0 : i32
    return %arg0, %c0_i32, %c0_i32_0 : i32, i32, i32
  }
  func.func @transform_1(%arg0: i32) -> (i32, i32) {
    %c0_i32 = arith.constant 0 : i32
    %c0_i32_0 = arith.constant 0 : i32
    %c0_i32_1 = arith.constant 0 : i32
    return %c0_i32, %c0_i32_0 : i32, i32
  }
  func.func @transform_2(%arg0: i32) -> (i32, i32) {
    %c0_i32 = arith.constant 0 : i32
    %c0_i32_0 = arith.constant 0 : i32
    %c0_i32_1 = arith.constant 0 : i32
    return %c0_i32, %c0_i32_0 : i32, i32
  }
  func.func @transform_3(%arg0: i32) -> (i32, i32) {
    %c0_i32 = arith.constant 0 : i32
    %c0_i32_0 = arith.constant 0 : i32
    %c0_i32_1 = arith.constant 0 : i32
    return %c0_i32, %c0_i32_0 : i32, i32
  }
  func.func @transform_4(%arg0: i32) -> (i32, i32) {
    %c0_i32 = arith.constant 0 : i32
    %c0_i32_0 = arith.constant 0 : i32
    %c0_i32_1 = arith.constant 0 : i32
    return %c0_i32, %c0_i32_0 : i32, i32
  }
  func.func @transform_5(%arg0: i32) -> (i32, i32) {
    %c0_i32 = arith.constant 0 : i32
    %c0_i32_0 = arith.constant 0 : i32
    %c0_i32_1 = arith.constant 0 : i32
    return %c0_i32, %c0_i32_0 : i32, i32
  }
  func.func @transform_6(%arg0: i32) -> (i32, i32) {
    %c0_i32 = arith.constant 0 : i32
    %c0_i32_0 = arith.constant 0 : i32
    %c0_i32_1 = arith.constant 0 : i32
    return %c0_i32, %c0_i32_0 : i32, i32
  }
  func.func @transform_7(%arg0: i32) -> (i32, i32) {
    %c0_i32 = arith.constant 0 : i32
    %c0_i32_0 = arith.constant 0 : i32
    %c0_i32_1 = arith.constant 0 : i32
    return %c0_i32, %c0_i32_0 : i32, i32
  }
  func.func @transform_8(%arg0: i32) -> (i32, i32, i32) {
    %c0_i32 = arith.constant 0 : i32
    %c0_i32_0 = arith.constant 0 : i32
    %c0_i32_1 = arith.constant 0 : i32
    %c0_i32_2 = arith.constant 0 : i32
    return %c0_i32, %c0_i32_0, %c0_i32_1 : i32, i32, i32
  }
  func.func @transform_9(%arg0: i32) -> (i32, i32) {
    %c0_i32 = arith.constant 0 : i32
    %c0_i32_0 = arith.constant 0 : i32
    %c0_i32_1 = arith.constant 0 : i32
    return %c0_i32, %c0_i32_0 : i32, i32
  }
  func.func @transform_10(%arg0: i32) -> (i32, i32) {
    %c0_i32 = arith.constant 0 : i32
    %c0_i32_0 = arith.constant 0 : i32
    %c0_i32_1 = arith.constant 0 : i32
    return %c0_i32, %c0_i32_0 : i32, i32
  }
  func.func @transform_11(%arg0: i32) -> (i32, i32) {
    %c0_i32 = arith.constant 0 : i32
    %c0_i32_0 = arith.constant 0 : i32
    %c0_i32_1 = arith.constant 0 : i32
    return %c0_i32, %c0_i32_0 : i32, i32
  }
  func.func @transform_12(%arg0: i32) -> (i32, i32) {
    %c0_i32 = arith.constant 0 : i32
    %c0_i32_0 = arith.constant 0 : i32
    %c0_i32_1 = arith.constant 0 : i32
    return %c0_i32, %c0_i32_0 : i32, i32
  }
  func.func @transform_13(%arg0: i32) -> (i32, i32) {
    %c0_i32 = arith.constant 0 : i32
    %c0_i32_0 = arith.constant 0 : i32
    %c0_i32_1 = arith.constant 0 : i32
    return %c0_i32, %c0_i32_0 : i32, i32
  }
  func.func @transform_14(%arg0: i32) -> (i32, i32) {
    %c0_i32 = arith.constant 0 : i32
    %c0_i32_0 = arith.constant 0 : i32
    %c0_i32_1 = arith.constant 0 : i32
    return %c0_i32, %c0_i32_0 : i32, i32
  }
  func.func @transform_15(%arg0: i32) -> (i32, i32) {
    %c0_i32 = arith.constant 0 : i32
    %c0_i32_0 = arith.constant 0 : i32
    %c0_i32_1 = arith.constant 0 : i32
    return %c0_i32, %c0_i32_0 : i32, i32
  }
  func.func @transform_16(%arg0: i32) -> (i32, i32, i32) {
    %c0_i32 = arith.constant 0 : i32
    %c0_i32_0 = arith.constant 0 : i32
    %c0_i32_1 = arith.constant 0 : i32
    return %arg0, %c0_i32, %c0_i32_0 : i32, i32, i32
  }
  func.func @transform_17(%arg0: i32) -> (i32, i32, i32) {
    %c0_i32 = arith.constant 0 : i32
    %c0_i32_0 = arith.constant 0 : i32
    %c0_i32_1 = arith.constant 0 : i32
    return %arg0, %c0_i32, %c0_i32_0 : i32, i32, i32
  }
  func.func @transform_18(%arg0: i32) -> (i32, i32, i32) {
    %c0_i32 = arith.constant 0 : i32
    %c0_i32_0 = arith.constant 0 : i32
    %c0_i32_1 = arith.constant 0 : i32
    return %arg0, %c0_i32, %c0_i32_0 : i32, i32, i32
  }
}

</mosaic_0001>

<bundles_post_ra>
// kernel: my_video_test_model.1
= control target key start
LH: loop header
LB: loop body
LE: loop exit
PB: predicated region body
PF: predicated region fallthrough
CT: control target
= control target key end

     0   :  { %s2653_s27 = smov 0   ;;  %s3264_s0 = inlined_call_operand.vmem [shape: f32[2,16,128], index: 0, kind: input, shape index: {}]   ;;  %s3265_s1 = inlined_call_operand.vmem [shape: bf16[384,192], index: 1, kind: input, shape index: {}]   ;;  %s3266_s2 = inlined_call_operand.vmem [shape: f32[1,192], index: 2, kind: input, shape index: {}]   ;;  %s3267_s3 = inlined_call_operand.vmem [shape: bf16[384,128], index: 3, kind: input, shape index: {}]   ;;  %s3268_s4 = inlined_call_operand.vmem [shape: f32[1,128], index: 4, kind: input, shape index: {}]   ;;  %s3269_s5 = inlined_call_operand.vmem [shape: bf16[128,128], index: 5, kind: input, shape index: {}]   ;;  %s3270_s6 = inlined_call_operand.vmem [shape: bf16[64,128], index: 6, kind: input, shape index: {}]   ;;  %s3271_s7 = inlined_call_operand.vmem [shape: f32[1,128], index: 7, kind: input, shape index: {}]   ;;  %s3272_s8 = inlined_call_operand.vmem [shape: bf16[3,64,64], index: 8, kind: input, shape index: {}]   ;;  %s3273_s9 = inlined_call_operand.vmem [shape: f32[1,64], index: 9, kind: input, shape index: {}]   ;;  %s3274_s10 = inlined_call_operand.vmem [shape: bf16[64,64], index: 10, kind: input, shape index: {}]   ;;  %s3275_s11 = inlined_call_operand.vmem [shape: f32[1,64], index: 11, kind: input, shape index: {}]   ;;  %s3276_s12 = inlined_call_operand.vmem [shape: bf16[64,64], index: 12, kind: input, shape index: {}]   ;;  %s3277_s13 = inlined_call_operand.vmem [shape: f32[1,64], index: 13, kind: input, shape index: {}]   ;;  %s3278_s14 = inlined_call_operand.vmem [shape: bf16[128,64], index: 14, kind: input, shape index: {}]   ;;  %s3279_s15 = inlined_call_operand.vmem [shape: f32[1,64], index: 15, kind: input, shape index: {}]   ;;  %s3280_s16 = inlined_call_operand.vmem [shape: f32[2,8,64], index: 16, kind: output, shape index: {0}]   ;;  %s3281_s17 = inlined_call_operand.vmem [shape: f32[2,14,64], index: 17, kind: output, shape index: {1}]   ;;  %s3282_s18 = inlined_call_operand.vmem [shape: f32[2,8,64], index: 18, kind: output, shape index: {2}]  }
   0x1   :  { %3284 = sst [smem:[#allocation2_spill]] %s3264_s0 }
   0x2   :  { %3285 = sst [smem:[#allocation3_spill]] %s3265_s1 }
   0x3   :  { %3286 = sst [smem:[#allocation4_spill]] %s3266_s2 }
   0x4 LB: > { %s1933_s28 = sadd.s32 4294967295, %s2556_s27   ;;  %p1937_p0 = scmp.ge.s32.totalorder %s2556_s27, 1  ;;  %s2556_s27 = sphi %s2653_s27, %s29_s27  }
   0x5   : > { %p517_p1 = scmp.lt.s32.totalorder %s2556_s27, 3 }
   0x7   : > { %p518_p2 = pnand %p1937_p0, %p517_p1 }
   0x8   : > { %s3287_s0 = sld [smem:[#allocation3_spill]] (!%p518_p2)  ;;  %p579_p3 = scmp.lt.s32.totalorder (!%p518_p2), %s1933_s28, 1 }
   0x9   : > { %521 = sbr.rel (%p518_p2) target bundleno = 966 (0x3c6), region = 84  ;;  %s3288_s26 = sld [smem:[#allocation2_spill]] (!%p518_p2) }
   0xa   : > { %s3289_s30 = sld [smem:[#allocation4_spill]] (!%p518_p2) }
   0xe   : > { %v2002_v0 = vld [vmem:[%s3287_s0 + $0x70] sm:$0xf]  ;;  %v2434_v1 = vld [vmem:[%s3287_s0 + $0x74] sm:$0xf0]  ;;  %v1994_v9 = vld [vmem:[%s3287_s0 + $0x60] sm:$0xf] }
   0xf   : > { %v2066_v2 = vld [vmem:[%s3287_s0 + $0xf0] sm:$0xf]  ;;  %v2003_v3 = vor.u32 %v2434_v1, %v2002_v0  ;;  %v2450_v4 = vld [vmem:[%s3287_s0 + $0xf4] sm:$0xf0]  ;;  %v2432_v10 = vld [vmem:[%s3287_s0 + $0x64] sm:$0xf0] }
  0x10   : > { %v2130_v5 = vld [vmem:[%s3287_s0 + $0x170] sm:$0xf]  ;;  %v2466_v6 = vld [vmem:[%s3287_s0 + $0x174] sm:$0xf0]  ;;  %v2067_v7 = vor.u32 %v2450_v4, %v2066_v2  ;;  %v2058_v11 = vld [vmem:[%s3287_s0 + $0xe0] sm:$0xf]  ;;  %v1995_v12 = vor.u32 %v2432_v10, %v1994_v9 }
  0x11   : > { %v2131_v8 = vor.u32 %v2466_v6, %v2130_v5  ;;  %911 = vmatpush.bf16.msra.mxu0 %v2003_v3  ;;  %v2448_v13 = vld [vmem:[%s3287_s0 + $0xe4] sm:$0xf0]  ;;  %v2122_v14 = vld [vmem:[%s3287_s0 + $0x160] sm:$0xf]  ;;  %v1986_v18 = vld [vmem:[%s3287_s0 + $0x50] sm:$0xf] }
  0x12   : > { %v2464_v15 = vld [vmem:[%s3287_s0 + $0x164] sm:$0xf0]  ;;  %925 = vmatpush.bf16.msra.mxu1 %v2067_v7  ;;  %v2059_v16 = vor.u32 %v2448_v13, %v2058_v11  ;;  %v2430_v19 = vld [vmem:[%s3287_s0 + $0x54] sm:$0xf0]  ;;  %v2050_v20 = vld [vmem:[%s3287_s0 + $0xd0] sm:$0xf] }
  0x13   : > { %939 = vmatpush.bf16.msra.mxu2 %v2131_v8  ;;  %v2123_v17 = vor.u32 %v2464_v15, %v2122_v14  ;;  %v2446_v21 = vld [vmem:[%s3287_s0 + $0xd4] sm:$0xf0]  ;;  %v2114_v22 = vld [vmem:[%s3287_s0 + $0x150] sm:$0xf]  ;;  %v1987_v24 = vor.u32 %v2430_v19, %v1986_v18  ;;  %v2433_v25 = vld [vmem:[%s3287_s0 + $0x74] sm:$0xf] }
  0x14   : > { %v2462_v23 = vld [vmem:[%s3287_s0 + $0x154] sm:$0xf0]  ;;  %v2004_v26 = vld [vmem:[%s3287_s0 + $0x78] sm:$0xf0]  ;;  %v2051_v27 = vor.u32 %v2446_v21, %v2050_v20  ;;  %v1978_v29 = vld [vmem:[%s3287_s0 + $0x40] sm:$0xf] }
  0x15   : > { %912 = vmatpush.bf16.msra.mxu0 %v1995_v12  ;;  %v2115_v28 = vor.u32 %v2462_v23, %v2114_v22  ;;  %v2428_v30 = vld [vmem:[%s3287_s0 + $0x44] sm:$0xf0]  ;;  %v2042_v31 = vld [vmem:[%s3287_s0 + $0xc0] sm:$0xf]  ;;  %v2007_v32 = vor.u32 %v2433_v25, %v2004_v26  ;;  %v2431_v36 = vld [vmem:[%s3287_s0 + $0x64] sm:$0xf] }
  0x16   : > { %926 = vmatpush.bf16.msra.mxu1 %v2059_v16  ;;  %v2444_v33 = vld [vmem:[%s3287_s0 + $0xc4] sm:$0xf0]  ;;  %v2106_v34 = vld [vmem:[%s3287_s0 + $0x140] sm:$0xf]  ;;  %v1996_v37 = vld [vmem:[%s3287_s0 + $0x68] sm:$0xf0]  ;;  %v1979_v38 = vor.u32 %v2428_v30, %v1978_v29 }
  0x17   : > { %940 = vmatpush.bf16.msra.mxu2 %v2123_v17  ;;  %v2460_v35 = vld [vmem:[%s3287_s0 + $0x144] sm:$0xf0]  ;;  %953 = vmatpush.bf16.msra.mxu3 %v2007_v32  ;;  %v1970_v39 = vld [vmem:[%s3287_s0 + $0x30] sm:$0xf]  ;;  %v2426_v40 = vld [vmem:[%s3287_s0 + $0x34] sm:$0xf0]  ;;  %v1999_v41 = vor.u32 %v2431_v36, %v1996_v37  ;;  %v2043_v42 = vor.u32 %v2444_v33, %v2042_v31 }
  0x18   : > { %v2107_v43 = vor.u32 %v2460_v35, %v2106_v34  ;;  %v2034_v44 = vld [vmem:[%s3287_s0 + $0xb0] sm:$0xf]  ;;  %v2442_v45 = vld [vmem:[%s3287_s0 + $0xb4] sm:$0xf0]  ;;  %v2429_v46 = vld [vmem:[%s3287_s0 + $0x54] sm:$0xf]  ;;  %v1971_v51 = vor.u32 %v2426_v40, %v1970_v39 }
  0x19   : > { %913 = vmatpush.bf16.msra.mxu0 %v1987_v24  ;;  %v2098_v47 = vld [vmem:[%s3287_s0 + $0x130] sm:$0xf]  ;;  %v2458_v48 = vld [vmem:[%s3287_s0 + $0x134] sm:$0xf0]  ;;  %v1988_v49 = vld [vmem:[%s3287_s0 + $0x58] sm:$0xf0]  ;;  %v2035_v54 = vor.u32 %v2442_v45, %v2034_v44 }
  0x1a   : > { %927 = vmatpush.bf16.msra.mxu1 %v2051_v27  ;;  %v1991_v50 = vor.u32 %v2429_v46, %v1988_v49  ;;  %v2427_v52 = vld [vmem:[%s3287_s0 + $0x44] sm:$0xf]  ;;  %v1980_v53 = vld [vmem:[%s3287_s0 + $0x48] sm:$0xf0]  ;;  %v2099_v55 = vor.u32 %v2458_v48, %v2098_v47  ;;  %v1962_v56 = vld [vmem:[%s3287_s0 + $0x20] sm:$0xf] }
  0x1b   : > { %941 = vmatpush.bf16.msra.mxu2 %v2115_v28  ;;  %954 = vmatpush.bf16.msra.mxu3 %v1999_v41  ;;  %v2424_v57 = vld [vmem:[%s3287_s0 + $0x24] sm:$0xf0]  ;;  %v2026_v58 = vld [vmem:[%s3287_s0 + $0xa0] sm:$0xf]  ;;  %v1983_v62 = vor.u32 %v2427_v52, %v1980_v53  ;;  %v2425_v0 = vld [vmem:[%s3287_s0 + $0x34] sm:$0xf] }
  0x1c   : > { %v2440_v59 = vld [vmem:[%s3287_s0 + $0xa4] sm:$0xf0]  ;;  %v2090_v60 = vld [vmem:[%s3287_s0 + $0x120] sm:$0xf]  ;;  %v1963_v63 = vor.u32 %v2424_v57, %v1962_v56  ;;  %v1972_v1 = vld [vmem:[%s3287_s0 + $0x38] sm:$0xf0] }
  0x1d   : > { %914 = vmatpush.bf16.msra.mxu0 %v1979_v38  ;;  %v2456_v61 = vld [vmem:[%s3287_s0 + $0x124] sm:$0xf0]  ;;  %v2027_v2 = vor.u32 %v2440_v59, %v2026_v58  ;;  %v1954_v4 = vld [vmem:[%s3287_s0 + $0x10] sm:$0xf]  ;;  %v2422_v5 = vld [vmem:[%s3287_s0 + $0x14] sm:$0xf0]  ;;  %v1975_v14 = vor.u32 %v2425_v0, %v1972_v1 }
  0x1e   : > { %928 = vmatpush.bf16.msra.mxu1 %v2043_v42  ;;  %v2091_v3 = vor.u32 %v2456_v61, %v2090_v60  ;;  %v2018_v6 = vld [vmem:[%s3287_s0 + $0x90] sm:$0xf]  ;;  %v2438_v7 = vld [vmem:[%s3287_s0 + $0x94] sm:$0xf0]  ;;  %v1946_v10 = vld [vmem:[%s3287_s0] sm:$0xf]  ;;  %v1955_v15 = vor.u32 %v2422_v5, %v1954_v4 }
  0x1f   : > { %942 = vmatpush.bf16.msra.mxu2 %v2107_v43  ;;  %955 = vmatpush.bf16.msra.mxu3 %v1991_v50  ;;  %v2082_v8 = vld [vmem:[%s3287_s0 + $0x110] sm:$0xf]  ;;  %v2454_v9 = vld [vmem:[%s3287_s0 + $0x114] sm:$0xf0]  ;;  %v2420_v11 = vld [vmem:[%s3287_s0 + $0x4] sm:$0xf0]  ;;  %v2019_v19 = vor.u32 %v2438_v7, %v2018_v6 }
  0x20   : > { %v2010_v12 = vld [vmem:[%s3287_s0 + $0x80] sm:$0xf]  ;;  %v2436_v13 = vld [vmem:[%s3287_s0 + $0x84] sm:$0xf0]  ;;  %v2449_v16 = vld [vmem:[%s3287_s0 + $0xf4] sm:$0xf]  ;;  %v2083_v20 = vor.u32 %v2454_v9, %v2082_v8  ;;  %v1947_v27 = vor.u32 %v2420_v11, %v1946_v10 }
  0x21   : > { %915 = vmatpush.bf16.msra.mxu0 %v1971_v51  ;;  %v2423_v17 = vld [vmem:[%s3287_s0 + $0x24] sm:$0xf]  ;;  %v1964_v18 = vld [vmem:[%s3287_s0 + $0x28] sm:$0xf0]  ;;  %v2068_v21 = vld [vmem:[%s3287_s0 + $0xf8] sm:$0xf0]  ;;  %v2011_v28 = vor.u32 %v2436_v13, %v2010_v12 }
  0x22   : > { %929 = vmatpush.bf16.msra.mxu1 %v2035_v54  ;;  %v2465_v22 = vld [vmem:[%s3287_s0 + $0x174] sm:$0xf]  ;;  %s3291_s28 = smov (!%p579_p3, %s1933_s28), 1  ;;  %v2132_v23 = vld [vmem:[%s3287_s0 + $0x178] sm:$0xf0]  ;;  %v1967_v26 = vor.u32 %v2423_v17, %v1964_v18  ;;  %v2071_v31 = vor.u32 %v2449_v16, %v2068_v21  ;;  %vm608_vm0 = vcmask 1045504  }
  0x23   : > { %943 = vmatpush.bf16.msra.mxu2 %v2099_v55  ;;  %956 = vmatpush.bf16.msra.mxu3 %v1983_v62  ;;  %v2074_v24 = vld [vmem:[%s3287_s0 + $0x100] sm:$0xf]  ;;  %v2452_v25 = vld [vmem:[%s3287_s0 + $0x104] sm:$0xf0]  ;;  %s2417_s23 = sshll.u32 %s3291_s28, 4  ;;  %v2135_v32 = vor.u32 %v2465_v22, %v2132_v23  ;;  %vm602_vm1 = vcmask 1046528  }
  0x24   : > { %s583_s29 = scalar_lea.vmem %s3288_s26, %s2417_s23  ;;  %v2421_v29 = vld [vmem:[%s3287_s0 + $0x14] sm:$0xf]  ;;  %v1956_v30 = vld [vmem:[%s3287_s0 + $0x18] sm:$0xf0]  ;;  %v2075_v33 = vor.u32 %v2452_v25, %v2074_v24  ;;  %v2447_v34 = vld [vmem:[%s3287_s0 + $0xe4] sm:$0xf]  ;;  %s592_s22 = scalar_lea.vmem %s3281_s17, %s2417_s23 }
  0x25   : > { %916 = vmatpush.bf16.msra.mxu0 %v1963_v63  ;;  %v598_v35 = vld [vmem:[%s583_s29] sm:$0xff]  ;;  %v599_v36 = vld [vmem:[%s583_s29 + $0x8] sm:$0xff]  ;;  %v1959_v44 = vor.u32 %v2421_v29, %v1956_v30  ;;  %v2445_v53 = vld [vmem:[%s3287_s0 + $0xd4] sm:$0xf]  ;;  %vm1036_vm2 = vcmask 523264   ;;  %vm1055_vm3 = vcmask 521216  }
  0x26   : > { %930 = vmatpush.bf16.msra.mxu1 %v2027_v2  ;;  %v2060_v37 = vld [vmem:[%s3287_s0 + $0xe8] sm:$0xf0]  ;;  %v609_v38 = vrot.slane %v598_v35, 2  ;;  %v610_v39 = vrot.slane %v599_v36, 2  ;;  %v603_v40 = vrot.slane %v598_v35, 1  ;;  %v614_v43 = vpack.c.bf16 %v599_v36, %v598_v35  ;;  %v2478_v35 = vld [vmem:[%s3272_s8 + $0x38] sm:$0xff] }
  0x27   : > { %944 = vmatpush.bf16.msra.mxu2 %v2091_v3  ;;  %957 = vmatpush.bf16.msra.mxu3 %v1975_v14  ;;  %v2463_v41 = vld [vmem:[%s3287_s0 + $0x164] sm:$0xf]  ;;  %v2124_v42 = vld [vmem:[%s3287_s0 + $0x168] sm:$0xf0]  ;;  %v604_v45 = vrot.slane %v599_v36, 1  ;;  %v2063_v49 = vor.u32 %v2447_v34, %v2060_v37  ;;  %v2473_v37 = vld [vmem:[%s3272_s8 + $0x10] sm:$0xff] }
  0x28   : > { %v611_v46 = vsel %vm608_vm0, %v609_v38, %v610_v39  ;;  %v2419_v47 = vld [vmem:[%s3287_s0 + $0x4] sm:$0xf]  ;;  %v1948_v48 = vld [vmem:[%s3287_s0 + $0x8] sm:$0xf0]  ;;  %v2127_v52 = vor.u32 %v2463_v41, %v2124_v42  ;;  %v2052_v54 = vld [vmem:[%s3287_s0 + $0xd8] sm:$0xf0] }
  0x29   : > { %917 = vmatpush.bf16.msra.mxu0 %v1955_v15  ;;  %v2889_v50 = vpack.c.bf16 %v610_v39, %v611_v46  ;;  %v605_v51 = vsel %vm602_vm1, %v603_v40, %v604_v45  ;;  %v2461_v56 = vld [vmem:[%s3287_s0 + $0x154] sm:$0xf]  ;;  %v2116_v57 = vld [vmem:[%s3287_s0 + $0x158] sm:$0xf0]  ;;  %v1951_v58 = vor.u32 %v2419_v47, %v1948_v48  ;;  %v2443_v59 = vld [vmem:[%s3287_s0 + $0xc4] sm:$0xf]  ;;  %v2055_v60 = vor.u32 %v2445_v53, %v2052_v54 }
  0x2a   : > { %931 = vmatpush.bf16.msra.mxu1 %v2019_v19  ;;  %v615_v55 = vpack.c.bf16 %v604_v45, %v605_v51  ;;  %v2119_v61 = vor.u32 %v2461_v56, %v2116_v57  ;;  %v2044_v62 = vld [vmem:[%s3287_s0 + $0xc8] sm:$0xf0]  ;;  %v2459_v63 = vld [vmem:[%s3287_s0 + $0x144] sm:$0xf]  ;;  %v2441_v3 = vld [vmem:[%s3287_s0 + $0xb4] sm:$0xf] }
  0x2b   : > { %945 = vmatpush.bf16.msra.mxu2 %v2083_v20  ;;  %958 = vmatpush.bf16.msra.mxu3 %v1967_v26  ;;  %v2108_v0 = vld [vmem:[%s3287_s0 + $0x148] sm:$0xf0]  ;;  %v2047_v1 = vor.u32 %v2443_v59, %v2044_v62  ;;  %v2036_v4 = vld [vmem:[%s3287_s0 + $0xb8] sm:$0xf0]  ;;  %v2457_v5 = vld [vmem:[%s3287_s0 + $0x134] sm:$0xf] }
  0x2c   : > { %v2111_v2 = vor.u32 %v2459_v63, %v2108_v0  ;;  %v2100_v6 = vld [vmem:[%s3287_s0 + $0x138] sm:$0xf0]  ;;  %v2039_v7 = vor.u32 %v2441_v3, %v2036_v4  ;;  %v2439_v9 = vld [vmem:[%s3287_s0 + $0xa4] sm:$0xf]  ;;  %v2028_v10 = vld [vmem:[%s3287_s0 + $0xa8] sm:$0xf0] }
  0x2d   : > { %918 = vmatpush.bf16.msra.mxu0 %v1947_v27  ;;  %v2103_v8 = vor.u32 %v2457_v5, %v2100_v6  ;;  %v2455_v11 = vld [vmem:[%s3287_s0 + $0x124] sm:$0xf]  ;;  %v2092_v12 = vld [vmem:[%s3287_s0 + $0x128] sm:$0xf0]  ;;  %v2031_v13 = vor.u32 %v2439_v9, %v2028_v10  ;;  %v2437_v15 = vld [vmem:[%s3287_s0 + $0x94] sm:$0xf] }
  0x2e   : > { %932 = vmatpush.bf16.msra.mxu1 %v2011_v28  ;;  %v2095_v14 = vor.u32 %v2455_v11, %v2092_v12  ;;  %v2020_v16 = vld [vmem:[%s3287_s0 + $0x98] sm:$0xf0]  ;;  %v2453_v17 = vld [vmem:[%s3287_s0 + $0x114] sm:$0xf]  ;;  %v2435_v21 = vld [vmem:[%s3287_s0 + $0x84] sm:$0xf] }
  0x2f   : > { %946 = vmatpush.bf16.msra.mxu2 %v2075_v33  ;;  %959 = vmatpush.bf16.msra.mxu3 %v1959_v44  ;;  %v2084_v18 = vld [vmem:[%s3287_s0 + $0x118] sm:$0xf0]  ;;  %v2023_v19 = vor.u32 %v2437_v15, %v2020_v16  ;;  %v2012_v22 = vld [vmem:[%s3287_s0 + $0x88] sm:$0xf0]  ;;  %v2451_v23 = vld [vmem:[%s3287_s0 + $0x104] sm:$0xf] }
  0x30   : > { %919 = vmatmul.bf16.vlgmr.msra.gmra.mxu0 %v614_v43  ;;  %v2087_v20 = vor.u32 %v2453_v17, %v2084_v18  ;;  %v2076_v24 = vld [vmem:[%s3287_s0 + $0x108] sm:$0xf0]  ;;  %v2015_v25 = vor.u32 %v2435_v21, %v2012_v22  ;;  %v2470_v27 = vld [vmem:[%s3276_s12 + $0x18] sm:$0xff]  ;;  %v2469_v28 = vld [vmem:[%s3276_s12 + $0x10] sm:$0xff]  ;;  %vm1346_vm4 = vcmask 1041408   ;;  %vm1341_vm5 = vcmask 1044480  }
  0x31   : > { %967 = vmatpush.bf16.msrb.mxu0 %v2071_v31  ;;  %933 = vmatmul.bf16.vlgmr.msra.gmra.mxu1 %v615_v55  ;;  %v2079_v26 = vor.u32 %v2451_v23, %v2076_v24  ;;  %v2468_v29 = vld [vmem:[%s3276_s12 + $0x8] sm:$0xff]  ;;  %v2467_v31 = vld [vmem:[%s3276_s12] sm:$0xff]  ;;  %v2474_v33 = vld [vmem:[%s3272_s8 + $0x18] sm:$0xff]  ;;  %s1940_s25 = sshll.u32 %s3291_s28, 3 }
  0x32   : > { %981 = vmatpush.bf16.msrb.mxu1 %v2135_v32  ;;  %947 = vmatmul.bf16.vlgmr.msra.gmra.mxu2 %v2889_v50  ;;  %v2988_v34 = vld [vmem:[%s3289_s30] sm:$0x3]  ;;  %v2477_v39 = vld [vmem:[%s3272_s8 + $0x30] sm:$0xff]  ;;  %v2472_v42 = vld [vmem:[%s3272_s8 + $0x8] sm:$0xff]  ;;  %s596_s20 = scalar_lea.vmem %s3282_s18, %s1940_s25  ;;  %s587_s19 = scalar_lea.vmem %s3280_s16, %s1940_s25 }
  0x33   : > { %960 = vmatpush.bf16.msra.mxu3 %v1951_v58  ;;  %1044 = vmatpush.bf16.msrb.mxu2 %v2470_v27  ;;  %v667_v36 = vperm.slane %v2988_v34, 0  ;;  %v2476_v44 = vld [vmem:[%s3272_s8 + $0x28] sm:$0xff]  ;;  %v2471_v45 = vld [vmem:[%s3272_s8] sm:$0xff]  ;;  %v2482_v47 = vld [vmem:[%s3272_s8 + $0x58] sm:$0xff] }
  0x34   : > { %v2475_v46 = vld [vmem:[%s3272_s8 + $0x20] sm:$0xff]  ;;  %v2480_v51 = vld [vmem:[%s3272_s8 + $0x48] sm:$0xff]  ;;  %v2497_v6 = vld [vmem:[%s3267_s3 + $0x30] sm:$0xff] }
  0x35   : > { %968 = vmatpush.bf16.msrb.mxu0 %v2063_v49  ;;  %v2481_v49 = vld [vmem:[%s3272_s8 + $0x50] sm:$0xff]  ;;  %v2496_v10 = vld [vmem:[%s3267_s3 + $0x28] sm:$0xff]  ;;  %v2495_v11 = vld [vmem:[%s3267_s3 + $0x20] sm:$0xff] }
  0x36   : > { %982 = vmatpush.bf16.msrb.mxu1 %v2127_v52  ;;  %961 = vmatmul.bf16.vlgmr.msra.gmra.mxu3 %v614_v43  ;;  %v2494_v12 = vld [vmem:[%s3267_s3 + $0x18] sm:$0xff]  ;;  %v2493_v15 = vld [vmem:[%s3267_s3 + $0x10] sm:$0xff]  ;;  %v2491_v21 = vld [vmem:[%s3267_s3] sm:$0xff] }
  0x37   : > { %1045 = vmatpush.bf16.msrb.mxu2 %v2469_v28  ;;  %1120 = vmatpush.bf16.msrb.mxu3 %v2478_v35  ;;  %v2486_v24 = vld [vmem:[%s3274_s10 + $0x18] sm:$0xff]  ;;  %v2483_v27 = vld [vmem:[%s3274_s10] sm:$0xff] }
  0x38   : > { %v2514_v28 = vld [vmem:[%s3267_s3 + $0xb8] sm:$0xff] }
  0x39   : > { %969 = vmatpush.bf16.msrb.mxu0 %v2055_v60 }
  0x3a   : > { %983 = vmatpush.bf16.msrb.mxu1 %v2119_v61 }
  0x3b   : > { %1046 = vmatpush.bf16.msrb.mxu2 %v2468_v29  ;;  %1121 = vmatpush.bf16.msrb.mxu3 %v2477_v39  ;;  %v2513_v29 = vld [vmem:[%s3267_s3 + $0xb0] sm:$0xff]  ;;  %v2508_v39 = vld [vmem:[%s3267_s3 + $0x88] sm:$0xff] }
  0x3d   : > { %970 = vmatpush.bf16.msrb.mxu0 %v2047_v1 }
  0x3e   : > { %984 = vmatpush.bf16.msrb.mxu1 %v2111_v2  ;;  %v2498_v2 = vld [vmem:[%s3267_s3 + $0x38] sm:$0xff] }
  0x3f   : > { %1047 = vmatpush.bf16.msrb.mxu2 %v2467_v31  ;;  %1122 = vmatpush.bf16.msrb.mxu3 %v2476_v44 }
  0x41   : > { %971 = vmatpush.bf16.msrb.mxu0 %v2039_v7 }
  0x42   : > { %985 = vmatpush.bf16.msrb.mxu1 %v2103_v8 }
  0x43   : > { %1160 = vmatpush.bf16.msra.mxu2 %v2474_v33  ;;  %1123 = vmatpush.bf16.msrb.mxu3 %v2475_v46  ;;  %v2543_v33 = vld [vmem:[%s3277_s13] ss:$0 sm:$0xff] }
  0x45   : > { %972 = vmatpush.bf16.msrb.mxu0 %v2031_v13 }
  0x46   : > { %986 = vmatpush.bf16.msrb.mxu1 %v2095_v14 }
  0x47   : > { %1161 = vmatpush.bf16.msra.mxu2 %v2473_v37  ;;  %1202 = vmatpush.bf16.msra.mxu3 %v2482_v47  ;;  %v2509_v37 = vld [vmem:[%s3267_s3 + $0x90] sm:$0xff] }
  0x48   : > { %v2489_v47 = vld [vmem:[%s3276_s12 + $0x10] sm:$0xff] }
  0x49   : > { %973 = vmatpush.bf16.msrb.mxu0 %v2023_v19  ;;  %v2492_v19 = vld [vmem:[%s3267_s3 + $0x8] sm:$0xff] }
  0x4a   : > { %987 = vmatpush.bf16.msrb.mxu1 %v2087_v20 }
  0x4b   : > { %1162 = vmatpush.bf16.msra.mxu2 %v2472_v42  ;;  %1203 = vmatpush.bf16.msra.mxu3 %v2481_v49  ;;  %v2507_v42 = vld [vmem:[%s3267_s3 + $0x80] sm:$0xff] }
  0x4c   : > { %v2544_v49 = vld [vmem:[%s3273_s9] ss:$0 sm:$0xff] }
  0x4d   : > { %974 = vmatpush.bf16.msrb.mxu0 %v2015_v25  ;;  %v2485_v25 = vld [vmem:[%s3274_s10 + $0x10] sm:$0xff] }
  0x4e   : > { %988 = vmatpush.bf16.msrb.mxu1 %v2079_v26  ;;  %v2484_v26 = vld [vmem:[%s3274_s10 + $0x8] sm:$0xff] }
  0x4f   : > { %1163 = vmatpush.bf16.msra.mxu2 %v2471_v45  ;;  %1204 = vmatpush.bf16.msra.mxu3 %v2480_v51  ;;  %v2490_v45 = vld [vmem:[%s3276_s12 + $0x18] sm:$0xff] }
  0x50   : > { %975 = vmatmul.bf16.vlgmr.msrb.gmra.mxu0 %v615_v55  ;;  %v2479_v55 = vld [vmem:[%s3272_s8 + $0x40] sm:$0xff] }
  0x51   : > { %989 = vmatmul.bf16.vlgmr.msrb.gmra.mxu1 %v2889_v50  ;;  %v668_v50 = vperm.slane %v2988_v34, 1  ;;  %1262 = vmatpush.bf16.msra.mxu0 %v2486_v24  ;;  %v2510_v34 = vld [vmem:[%s3267_s3 + $0x98] sm:$0xff] }
  0x53   : > { %1205 = vmatpush.bf16.msra.mxu3 %v2479_v55 }
  0x55   : > { %1263 = vmatpush.bf16.msra.mxu0 %v2485_v25 }
  0x59   : > { %1264 = vmatpush.bf16.msra.mxu0 %v2484_v26 }
  0x5d   : > { %1265 = vmatpush.bf16.msra.mxu0 %v2483_v27 }
  0x61   : > { %1576 = vmatpush.bf16.msrb.mxu0 %v2514_v28 }
  0x65   : > { %1577 = vmatpush.bf16.msrb.mxu0 %v2513_v29 }
  0xad   : > { %v2975_v30 = vpop.f32.mrf.mxu0 }
  0xae   : > { %v2980_v32 = vpop.f32.mrf.mxu1  ;;  %v921_v13 = vadd.f32 %v2975_v30, %v667_v36  ;;  %v2512_v30 = vld [vmem:[%s3267_s3 + $0xa8] sm:$0xff] }
  0xaf   : > { %1578 = vmatpush.bf16.msrb.mxu0 %v2512_v30 }
  0xb0   : > { %v935_v16 = vadd.f32 %v2980_v32, %v921_v13  ;;  %v2511_v32 = vld [vmem:[%s3267_s3 + $0xa0] sm:$0xff]  ;;  %v2502_v13 = vld [vmem:[%s3267_s3 + $0x58] sm:$0xff] }
  0xb3   : > { %1579 = vmatpush.bf16.msrb.mxu0 %v2511_v32 }
  0xb5   : > { %v922_v38 = vpop.f32.mrf.mxu0  ;;  %v948_v18 = vpop.f32.mrf.mxu2 }
  0xb6   : > { %v923_v40 = vadd.f32 %v922_v38, %v667_v36  ;;  %v936_v41 = vpop.f32.mrf.mxu1  ;;  %v949_v20 = vadd.f32 %v948_v18, %v935_v16  ;;  %v2499_v16 = vld [vmem:[%s3267_s3 + $0x40] sm:$0xff] }
  0xb7   : > { %1580 = vmatpush.bf16.msrb.mxu0 %v2510_v34 }
  0xb8   : > { %v3003_v43 = vadd.f32 %v936_v41, %v923_v40  ;;  %v3067_v22 = vmax.f32 %v949_v20, 0.0 }
  0xb9   : > { %v962_v48 = vpop.f32.mrf.mxu3 }
  0xba   : > { %v963_v53 = vadd.f32 %v962_v48, %v668_v50  ;;  %v1351_v23 = vpack.c.bf16 %v3067_v22, %v3067_v22 }
  0xbb   : > { %1581 = vmatpush.bf16.msrb.mxu0 %v2509_v37  ;;  %v2520_v37 = vld [vmem:[%s3269_s5 + $0x28] sm:$0xff] }
  0xbd   : > { %v950_v31 = vpop.f32.mrf.mxu2 }
  0xbf   : > { %1582 = vmatpush.bf16.msrb.mxu0 %v2508_v39  ;;  %v2518_v39 = vld [vmem:[%s3269_s5 + $0x18] sm:$0xff] }
  0xc1   : > { %v964_v56 = vpop.f32.mrf.mxu3 }
  0xc2   : > { %v965_v58 = vadd.f32 %v964_v56, %v668_v50  ;;  %v2488_v50 = vld [vmem:[%s3276_s12 + $0x8] sm:$0xff] }
  0xc3   : > { %1583 = vmatpush.bf16.msrb.mxu0 %v2507_v42  ;;  %v2515_v42 = vld [vmem:[%s3269_s5] sm:$0xff] }
  0xcd   : > { %v976_v52 = vpop.f32.mrf.mxu0 }
  0xce   : > { %v990_v54 = vpop.f32.mrf.mxu1  ;;  %v977_v57 = vadd.f32 %v976_v52, %v963_v53 }
  0xd0   : > { %v991_v60 = vadd.f32 %v990_v54, %v977_v57  ;;  %v951_v57 = vadd.f32 %v950_v31, %v3003_v43  ;;  %v2487_v43 = vld [vmem:[%s3276_s12] sm:$0xff] }
  0xd2   : > { %v3029_v0 = vmax.f32 %v991_v60, 0.0  ;;  %v3132_v60 = vmax.f32 %v951_v57, 0.0 }
  0xd4   : > { %v1081_v14 = vpack.c.bf16 %v3029_v0, %v3029_v0  ;;  %v1343_v34 = vrot.slane %v3132_v60, 3 }
  0xd5   : > { %v978_v59 = vpop.f32.mrf.mxu0 }
  0xd6   : > { %v979_v61 = vadd.f32 %v978_v59, %v965_v58  ;;  %v992_v62 = vpop.f32.mrf.mxu1 }
  0xd8   : > { %v3027_v63 = vadd.f32 %v992_v62, %v979_v61  ;;  %v1347_v61 = vrot.slane %v3067_v22, 6  ;;  %v1348_v62 = vrot.slane %v3132_v60, 6 }
  0xda   : > { %v998_v1 = vmax.f32 %v3027_v63, 0.0 }
  0xdc   : > { %v999_v3 = vpack.c.bf16 %v998_v1, %v3029_v0 }
  0xde   : > { %2152 = vmatmul.msk.bf16.vlgmr.msrb.gmra.mxu2 %vm1036_vm2, %v999_v3  ;;  %v1082_v4 = vshrl.u32 %v999_v3, 16  ;;  %v1085_v5 = vshll.u32 %v999_v3, 16  ;;  %v1170_v17 = vrot.slane %v999_v3, 3  ;;  %v1349_v3 = vsel %vm1346_vm4, %v1347_v61, %v1348_v62 }
  0xdf   : > { %1550 = vmatpush.bf16.msrb.mxu2 %v2498_v2 }
  0xe0   : > { %v1084_v7 = vrot.slane %v1082_v4, 1  ;;  %v1087_v8 = vrot.slane %v1085_v5, 2  ;;  %v1353_v4 = vpack.c.bf16 %v1349_v3, %v1349_v3  ;;  %v2506_v5 = vld [vmem:[%s3267_s3 + $0x78] sm:$0xff] }
  0xe1   : > { %v2530_v3 = vld [vmem:[%s3278_s14 + $0x18] sm:$0xff] }
  0xe2   : > { %v1088_v9 = vor.u32 %v1087_v8, %v1084_v7  ;;  %v2505_v7 = vld [vmem:[%s3267_s3 + $0x70] sm:$0xff] }
  0xe3   : > { %1551 = vmatpush.bf16.msrb.mxu2 %v2497_v6  ;;  %v2526_v6 = vld [vmem:[%s3270_s6 + $0x18] sm:$0xff]  ;;  %v2525_v8 = vld [vmem:[%s3270_s6 + $0x10] sm:$0xff] }
  0xe4   : > { %2169 = vmatmul.msk.bf16.vlgmr.msrb.gmra.mxu3 %vm1036_vm2, %v1088_v9  ;;  %1643 = vmatpush.bf16.msra.mxu1 %v2526_v6  ;;  %v2504_v9 = vld [vmem:[%s3267_s3 + $0x68] sm:$0xff] }
  0xe5   : > { %1329 = vmatpush.bf16.msrb.mxu3 %v2490_v45 }
  0xe7   : > { %1552 = vmatpush.bf16.msrb.mxu2 %v2496_v10  ;;  %v2524_v10 = vld [vmem:[%s3270_s6 + $0x8] sm:$0xff] }
  0xe8   : > { %1644 = vmatpush.bf16.msra.mxu1 %v2525_v8 }
  0xe9   : > { %1330 = vmatpush.bf16.msrb.mxu3 %v2489_v47  ;;  %v2547_v47 = vld [vmem:[%s3277_s13] ss:$0 sm:$0xff] }
  0xeb   : > { %1553 = vmatpush.bf16.msrb.mxu2 %v2495_v11  ;;  %v2503_v11 = vld [vmem:[%s3267_s3 + $0x60] sm:$0xff] }
  0xec   : > { %1645 = vmatpush.bf16.msra.mxu1 %v2524_v10 }
  0xed   : > { %1331 = vmatpush.bf16.msrb.mxu3 %v2488_v50 }
  0xee   : > { %2186 = vmatmul.msk.bf16.vlgmr.msra.gmra.mxu2 %vm1036_vm2, %v1081_v14  ;;  %v2501_v14 = vld [vmem:[%s3267_s3 + $0x50] sm:$0xff] }
  0xef   : > { %1554 = vmatpush.bf16.msrb.mxu2 %v2494_v12  ;;  %v2523_v12 = vld [vmem:[%s3270_s6] sm:$0xff] }
  0xf0   : > { %1646 = vmatpush.bf16.msra.mxu1 %v2523_v12 }
  0xf1   : > { %1332 = vmatpush.bf16.msrb.mxu3 %v2487_v43  ;;  %v2527_v43 = vld [vmem:[%s3278_s14] sm:$0xff] }
  0xf3   : > { %1555 = vmatpush.bf16.msrb.mxu2 %v2493_v15  ;;  %v2500_v15 = vld [vmem:[%s3267_s3 + $0x48] sm:$0xff] }
  0xf4   : > { %2203 = vmatmul.msk.bf16.vlgmr.msra.gmra.mxu3 %vm1036_vm2, %v1170_v17  ;;  %v2546_v17 = vld [vmem:[%s3275_s11] ss:$0 sm:$0xff] }
  0xf5   : > { %1563 = vmatpush.bf16.msra.mxu3 %v2506_v5  ;;  %v2548_v5 = vld [vmem:[%s3271_s7] ss:$0 sm:$0xff] }
  0xf7   : > { %1556 = vmatpush.bf16.msrb.mxu2 %v2492_v19 }
  0xf9   : > { %1564 = vmatpush.bf16.msra.mxu3 %v2505_v7 }
  0xfb   : > { %1557 = vmatpush.bf16.msrb.mxu2 %v2491_v21 }
  0xfd   : > { %1565 = vmatpush.bf16.msra.mxu3 %v2504_v9 }
  0xfe   : > { %1558 = vmatmul.bf16.vlgmr.msrb.gmra.mxu2 %v1351_v23 }
 0x101   : > { %1566 = vmatpush.bf16.msra.mxu3 %v2503_v11 }
 0x105   : > { %1567 = vmatpush.bf16.msra.mxu3 %v2502_v13 }
 0x109   : > { %1568 = vmatpush.bf16.msra.mxu3 %v2501_v14 }
 0x10d   : > { %1569 = vmatpush.bf16.msra.mxu3 %v2500_v15 }
 0x111   : > { %1570 = vmatpush.bf16.msra.mxu3 %v2499_v16 }
 0x161   : > { %v1049_v35 = vpop.f32.mrf.mxu2 }
 0x162   : > { %v1050_v36 = vadd.f32 %v2543_v33, %v1049_v35  ;;  %v2522_v35 = vld [vmem:[%s3269_s5 + $0x38] sm:$0xff] }
 0x163   : > { %1700 = vmatpush.bf16.msrb.mxu1 %v2522_v35 }
 0x164   : > { %1054 = vst.msk [vmem:[%s592_s22] sm:$0xff] %vm1036_vm2, %v1050_v36  ;;  %v2521_v36 = vld [vmem:[%s3269_s5 + $0x30] sm:$0xff] }
 0x167   : > { %v1125_v38 = vpop.f32.mrf.mxu3  ;;  %1701 = vmatpush.bf16.msrb.mxu1 %v2521_v36 }
 0x169   : > { %v1051_v40 = vpop.f32.mrf.mxu2 }
 0x16a   : > { %v1052_v41 = vadd.f32 %v2543_v33, %v1051_v40  ;;  %v1342_v33 = vrot.slane %v3067_v22, 3  ;;  %v2517_v40 = vld [vmem:[%s3269_s5 + $0x10] sm:$0xff] }
 0x16b   : > { %1702 = vmatpush.bf16.msrb.mxu1 %v2520_v37 }
 0x16c   : > { %1056 = vst.msk [vmem:[%s592_s22 + $0x8] sm:$0x3f] %vm1055_vm3, %v1052_v41  ;;  %v1344_v63 = vsel %vm1341_vm5, %v1342_v33, %v1343_v34  ;;  %v2516_v41 = vld [vmem:[%s3269_s5 + $0x8] sm:$0xff] }
 0x16f   : > { %v1127_v44 = vpop.f32.mrf.mxu3 }
 0x170   : > { %v2534_v44 = vld [vmem:[%s3278_s14 + $0x38] sm:$0xff] }
 0x171   : > { %v1165_v46 = vpop.f32.mrf.mxu2  ;;  %1802 = vmatpush.bf16.msra.mxu2 %v2534_v44 }
 0x172   : > { %v1166_v48 = vadd.f32 %v1165_v46, %v1125_v38  ;;  %v2519_v38 = vld [vmem:[%s3269_s5 + $0x20] sm:$0xff]  ;;  %v2533_v46 = vld [vmem:[%s3278_s14 + $0x30] sm:$0xff] }
 0x173   : > { %1703 = vmatpush.bf16.msrb.mxu1 %v2519_v38 }
 0x175   : > { %1803 = vmatpush.bf16.msra.mxu2 %v2533_v46 }
 0x177   : > { %v1207_v51 = vpop.f32.mrf.mxu3  ;;  %1704 = vmatpush.bf16.msrb.mxu1 %v2518_v39 }
 0x178   : > { %v1211_v52 = vadd.f32 %v1207_v51, %v1166_v48  ;;  %v2532_v48 = vld [vmem:[%s3278_s14 + $0x28] sm:$0xff] }
 0x179   : > { %v1167_v53 = vpop.f32.mrf.mxu2  ;;  %1804 = vmatpush.bf16.msra.mxu2 %v2532_v48 }
 0x17a   : > { %v1216_v54 = vadd.f32 %v2544_v49, %v1211_v52  ;;  %v2545_v53 = vld [vmem:[%s3268_s4] ss:$0 sm:$0xff] }
 0x17b   : > { %1705 = vmatpush.bf16.msrb.mxu1 %v2517_v40 }
 0x17c   : > { %v1217_v55 = vmax.f32 %v1216_v54, 0.0 }
 0x17e   : > { %v1218_v56 = vpack.c.bf16 %v1217_v55, %v1217_v55 }
 0x17f   : > { %v1209_v58 = vpop.f32.mrf.mxu3  ;;  %1706 = vmatpush.bf16.msrb.mxu1 %v2516_v41 }
 0x180   : > { %2220 = vmatmul.msk.bf16.vlgmr.msra.gmra.mxu0 %vm1036_vm2, %v1218_v56 }
 0x181   : > { %v3130_v59 = vpop.f32.mrf.mxu2 }
 0x182   : > { %v1560_v54 = vadd.f32 %v2545_v53, %v3130_v59  ;;  %v2529_v59 = vld [vmem:[%s3278_s14 + $0x10] sm:$0xff] }
 0x183   : > { %1707 = vmatpush.bf16.msrb.mxu1 %v2515_v42 }
 0x189   : > { %v1561_v2 = vpop.f32.mrf.mxu2 }
 0x18a   : > { %v2531_v2 = vld [vmem:[%s3278_s14 + $0x20] sm:$0xff] }
 0x18b   : > { %1805 = vmatpush.bf16.msra.mxu2 %v2531_v2 }
 0x18f   : > { %1806 = vmatpush.bf16.msra.mxu2 %v2530_v3 }
 0x190   : > { %1584 = vmatmul.bf16.vlgmr.msrb.gmra.mxu0 %v1353_v4  ;;  %v2528_v4 = vld [vmem:[%s3278_s14 + $0x8] sm:$0xff] }
 0x193   : > { %1807 = vmatpush.bf16.msra.mxu2 %v2529_v59 }
 0x197   : > { %1808 = vmatpush.bf16.msra.mxu2 %v2528_v4 }
 0x19b   : > { %1809 = vmatpush.bf16.msra.mxu2 %v2527_v43 }
 0x1fd   : > { %v1267_v18 = vpop.f32.mrf.mxu0 }
 0x1fe   : > { %v1268_v19 = vadd.f32 %v2546_v17, %v1267_v18 }
 0x200   : > { %v1271_v20 = vmax.f32 %v1268_v19, 0.0 }
 0x202   : > { %v1273_v21 = vrot.slane %v1271_v20, 5  ;;  %v2549_v20 = vld [vmem:[%s3279_s15] ss:$0 sm:$0xff] }
 0x204   : > { %v1275_v23 = vadd.f32 %v1273_v21, %v3029_v0  ;;  %v1276_v24 = vadd.f32 %v1273_v21, %v998_v1  ;;  %v1352_v1 = vpack.c.bf16 %v1344_v63, %v1344_v63 }
 0x205   : > { %v1269_v25 = vpop.f32.mrf.mxu0 }
 0x206   : > { %v1277_v26 = vpack.c.bf16 %v1276_v24, %v1275_v23 }
 0x208   : > { %v1291_v27 = vshrl.u32 %v1277_v26, 16  ;;  %v1294_v28 = vshll.u32 %v1277_v26, 16 }
 0x20a   : > { %v1293_v29 = vrot.slane %v1291_v27, 1  ;;  %v1296_v30 = vrot.slane %v1294_v28, 2 }
 0x20c   : > { %v1297_v31 = vor.u32 %v1296_v30, %v1293_v29 }
 0x20d   : > { %v1585_v32 = vpop.f32.mrf.mxu0 }
 0x20e   : > { %2237 = vmatmul.msk.bf16.vlgmr.msrb.gmra.mxu3 %vm1036_vm2, %v1297_v31  ;;  %2350 = vmatmul.msk.bf16.vlgmr.msra.gmra.mxu1 %vm1036_vm2, %v1297_v31 }
 0x215   : > { %v1587_v0 = vpop.f32.mrf.mxu0 }
 0x21e   : > { %1571 = vmatmul.bf16.vlgmr.msra.gmra.mxu3 %v1352_v1 }
 0x28b   : > { %v1648_v45 = vpop.f32.mrf.mxu1 }
 0x291   : > { %v1334_v49 = vpop.f32.mrf.mxu3 }
 0x292   : > { %v1335_v50 = vadd.f32 %v2547_v47, %v1334_v49 }
 0x293   : > { %v1650_v51 = vpop.f32.mrf.mxu1 }
 0x294   : > { %1338 = vst.msk [vmem:[%s596_s20] sm:$0xff] %vm1036_vm2, %v1335_v50 }
 0x299   : > { %v1336_v52 = vpop.f32.mrf.mxu3 }
 0x2a1   : > { %v1572_v55 = vpop.f32.mrf.mxu3 }
 0x2a2   : > { %v1573_v56 = vadd.f32 %v1572_v55, %v1560_v54 }
 0x2a4   : > { %v1586_v57 = vadd.f32 %v1585_v32, %v1573_v56 }
 0x2a6   : > { %v1589_v58 = vmax.f32 %v1586_v57, 0.0 }
 0x2a8   : > { %v1590_v61 = vpack.c.bf16 %v1589_v58, %v1589_v58 }
 0x2a9   : > { %v1574_v62 = vpop.f32.mrf.mxu3 }
 0x2aa   : > { %1708 = vmatmul.bf16.vlgmr.msrb.gmra.mxu1 %v1590_v61 }
 0x327   : > { %v1709_v6 = vpop.f32.mrf.mxu1 }
 0x328   : > { %v1710_v7 = vadd.f32 %v1709_v6, %v1648_v45 }
 0x32a   : > { %v1717_v8 = vadd.f32 %v2548_v5, %v1710_v7 }
 0x32c   : > { %v1718_v9 = vmax.f32 %v1717_v8, 0.0 }
 0x32e   : > { %v1720_v10 = vrot.slane %v1718_v9, 5 }
 0x32f   : > { %v1711_v11 = vpop.f32.mrf.mxu1 }
 0x330   : > { %v1722_v12 = vadd.f32 %v1720_v10, %v3067_v22  ;;  %v1723_v13 = vadd.f32 %v1720_v10, %v3132_v60 }
 0x332   : > { %v1724_v14 = vpack.c.bf16 %v1723_v13, %v1722_v12 }
 0x334   : > { %v1746_v15 = vshrl.u32 %v1724_v14, 16  ;;  %v1749_v16 = vshll.u32 %v1724_v14, 16 }
 0x336   : > { %v1748_v17 = vrot.slane %v1746_v15, 1  ;;  %v1751_v18 = vrot.slane %v1749_v16, 2 }
 0x338   : > { %v1752_v19 = vor.u32 %v1751_v18, %v1748_v17 }
 0x33a   : > { %1810 = vmatmul.bf16.vlgmr.msra.gmra.mxu2 %v1752_v19 }
 0x3bd   : > { %v1811_v21 = vpop.f32.mrf.mxu2 }
 0x3be   : > { %v1812_v22 = vadd.f32 %v2549_v20, %v1811_v21 }
 0x3c0   : > { %1815 = vst.msk [vmem:[%s587_s19] sm:$0xff] %vm1036_vm2, %v1812_v22 }
 0x3c5   : > { %v1813_v60 = vpop.f32.mrf.mxu2 }
 0x3c6 PF: > { %s29_s27 = sadd.s32 1, %s2556_s27  }
 0x3c7   : > { %p26_p4 = scmp.ge.s32.totalorder %s29_s27, 4  }
 0x3c9   :  { %28 = sbr.rel (!%p26_p4) target bundleno = 4 (0x4), region = 138 }

</bundles_post_ra>
